<compile_context>
chip_gen: v6e
topology: v6e:2x2x1
jax: 0.10.0
libtpu: 0.0.40
codegen_flags: <defaults>
</compile_context>

<pallas_src>
import jax
import jax.numpy as jnp
from jax.experimental import pallas as pl
from jax.experimental.pallas import tpu as pltpu


def _round_up(x, m):
    return (x + m - 1) // m * m


def _round_down_pos(x, m):
    return max(m, (x // m) * m)


def label_task_kernel(mem_ref, keep_ref, labels_ref,
                      w1_ref, b1_ref, w2_ref, b2_ref,
                      bce_ref, acc_ref):
    """Grid = (B_tiles, S_tiles); S (axis 1) is the trailing reduction axis.

    mem_ref   : (bt, st, E)  tile of graph_memory (f32 or bf16)
    keep_ref  : (st, 1)      keep mask pre-scaled by 1/num_kept (f32)
    labels_ref: (bt, 1)      float labels for this batch tile
    w1/b1/w2/b2              full MLP params (VMEM-resident, constant blocks)
    bce_ref   : (bt, 1)      per-sample BCE output (written at last S step)
    acc_ref   : (bt, E) f32  VMEM scratch accumulator
    """
    s_idx = pl.program_id(1)
    ns = pl.num_programs(1)

    @pl.when(s_idx == 0)
    def _init():
        acc_ref[...] = jnp.zeros_like(acc_ref)

    # Masked, pre-normalized partial sum over this S tile:
    #   acc[b, e] += sum_s mem[b, s, e] * keep_scaled[s]
    # graph_memory may be streamed as bf16: upcast per tile, accumulate in f32.
    mem = mem_ref[...].astype(jnp.float32)          # (bt, st, E)
    keep = keep_ref[...]                            # (st, 1) broadcasts over bt, E
    acc_ref[...] += jnp.sum(mem * keep, axis=1)     # (bt, E)
    # NOTE: this could contract `st` on the MXU via lax.dot_general instead,
    # but the kernel is HBM-bound and the VPU/XLU slots have ample slack.

    # Tiny MLP + sigmoid + BCE epilogue: runs once per batch tile.
    @pl.when(s_idx == ns - 1)
    def _finalize():
        ge = acc_ref[...]                                               # (bt, E)
        h = jnp.dot(ge, w1_ref[...],
                    preferred_element_type=jnp.float32) + b1_ref[...]   # (bt, H)
        h = jnp.maximum(h, 0.0)
        score = jnp.dot(h, w2_ref[...],
                        preferred_element_type=jnp.float32) + b2_ref[...]  # (bt, 1)
        prob = jax.nn.sigmoid(score)
        y = labels_ref[...]
        # nn.BCELoss clamps the log terms at -100
        logp = jnp.maximum(jnp.log(prob), -100.0)
        log1mp = jnp.maximum(jnp.log(1.0 - prob), -100.0)
        bce_ref[...] = -(y * logp + (1.0 - y) * log1mp)                 # (bt, 1)


def _choose_tiles(B, S, E, itemsize, block_b, block_s):
    """VMEM-budget-driven tile selection (per perf review)."""
    # Sub-32-bit dtypes pack along sublanes -> min second-to-last tile dim.
    s_mult = {4: 8, 2: 16, 1: 32}.get(itemsize, 8)

    try:
        # Per-TensorCore VMEM: ~128 MiB on v5e/v6e, 64 MiB on v7x.
        vmem_cap = int(pltpu.get_tpu_info().vmem_capacity_bytes)
    except Exception:
        vmem_cap = 64 * 1024 * 1024  # conservative (v7x) fallback

    # Budget for the double-buffered graph_memory stream (the only big tensor):
    # ~35 MiB on v7x, ~70-80 MiB on v5e/v6e.
    mem_pair_budget = min(int(0.55 * vmem_cap), 80 * 1024 * 1024)

    # ---- block_b (sublane-tile of the batch axis) --------------------------
    b_ceil = _round_up(B, 8)
    if block_b is None:
        block_b = min(b_ceil, 64)
        if b_ceil >= 16:
            # Keep >= 2 B tiles so the "parallel" axis shards across both
            # TensorCores on v7x (harmless on v5e/v6e).
            block_b = min(block_b, _round_down_pos(b_ceil // 2, 8))
    else:
        block_b = _round_up(block_b, 8)
    # Shrink block_b if even the smallest legal S tile would blow the budget.
    while block_b > 8 and 2 * block_b * s_mult * E * itemsize > mem_pair_budget:
        block_b = _round_down_pos(block_b // 2, 8)

    # ---- block_s (reduction-axis tile) --------------------------------------
    s_ceil = _round_up(S, s_mult)
    if block_s is None:
        fit = mem_pair_budget // (2 * block_b * E * itemsize)
        block_s = _round_down_pos(min(int(fit), s_ceil), s_mult)
    else:
        block_s = min(_round_up(block_s, s_mult), s_ceil)

    B_pad = _round_up(B, block_b)
    S_pad = _round_up(S, block_s)

    # VMEM limit derived from the actual tiles; capped at 75% of physical VMEM.
    mem_pair_bytes = 2 * block_b * block_s * E * itemsize
    vmem_limit = mem_pair_bytes + (6 << 20)     # + scratch, weights, small specs
    vmem_limit = max(16 << 20, min(vmem_limit, int(0.75 * vmem_cap)))
    return block_b, block_s, B_pad, S_pad, vmem_limit


def label_task_loss(graph_memory, padding_mask, labels, params,
                    *, block_b=None, block_s=None):
    """graph_memory: (B, S, E) float (f32 or bf16, streamed in native dtype);
    padding_mask: (B, S) bool (True = pad); labels: (B,) in {0, 1}.
    Returns scalar BCE loss (mean reduction), matching LabelTask.forward."""
    B, S, E = graph_memory.shape
    w1, b1, w2, b2 = params
    itemsize = jnp.dtype(graph_memory.dtype).itemsize
    block_b, block_s, B_pad, S_pad, vmem_limit = _choose_tiles(
        B, S, E, itemsize, block_b, block_s)

    # --- cheap O(B*S) prework hoisted out of the kernel ----------------------
    # graph_memory[:, ~mask.all(0)].mean(1) == masked-sum over S * (1/num_kept)
    keep = (jnp.sum(padding_mask.astype(jnp.float32), axis=0) < B).astype(jnp.float32)
    # TODO(synk): PyTorch would produce NaN if every column is padded; we clamp.
    num_kept = jnp.maximum(jnp.sum(keep), 1.0)
    keep_scaled = (keep / num_kept).reshape(S, 1)
    labels_f = labels.astype(jnp.float32).reshape(B, 1)

    # Pad ragged B / S to tile multiples (only copies when actually ragged;
    # padded S positions get keep weight 0, padded B rows are dropped below).
    if S_pad != S:
        graph_memory = jnp.pad(graph_memory, ((0, 0), (0, S_pad - S), (0, 0)))
        keep_scaled = jnp.pad(keep_scaled, ((0, S_pad - S), (0, 0)))
    if B_pad != B:
        graph_memory = jnp.pad(graph_memory, ((0, B_pad - B), (0, 0), (0, 0)))
        labels_f = jnp.pad(labels_f, ((0, B_pad - B), (0, 0)))

    nb, ns = B_pad // block_b, S_pad // block_s

    grid_spec = pltpu.PrefetchScalarGridSpec(
        num_scalar_prefetch=0,
        grid=(nb, ns),
        in_specs=[
            pl.BlockSpec((block_b, block_s, E), lambda i, k: (i, k, 0)),  # mem
            pl.BlockSpec((block_s, 1), lambda i, k: (k, 0)),              # keep
            pl.BlockSpec((block_b, 1), lambda i, k: (i, 0)),              # labels
            pl.BlockSpec(w1.shape, lambda i, k: (0, 0)),                  # w1
            pl.BlockSpec(b1.shape, lambda i, k: (0, 0)),                  # b1
            pl.BlockSpec(w2.shape, lambda i, k: (0, 0)),                  # w2
            pl.BlockSpec(b2.shape, lambda i, k: (0, 0)),                  # b2
        ],
        out_specs=pl.BlockSpec((block_b, 1), lambda i, k: (i, 0)),
        scratch_shapes=[pltpu.VMEM((block_b, E), jnp.float32)],
    )

    bce = pl.pallas_call(
        label_task_kernel,
        out_shape=jax.ShapeDtypeStruct((B_pad, 1), jnp.float32),
        grid_spec=grid_spec,
        compiler_params=pltpu.CompilerParams(
            # B tiles are independent (disjoint output blocks) -> megacore-safe;
            # S is the accumulation axis and must stay sequential.
            dimension_semantics=("parallel", "arbitrary"),
            vmem_limit_bytes=vmem_limit,
        ),
    )(graph_memory, keep_scaled, labels_f, w1, b1, w2, b2)

    return jnp.mean(bce[:B, 0])   # nn.BCELoss(reduction='mean') over real batch


def init_mlp_params(key, embed_dim, hidden_dims):
    """Deterministic init mimicking nn.Linear default (uniform +-1/sqrt(fan_in))."""
    assert hidden_dims[-1] == 1, "because is boolean"
    dims = [embed_dim] + list(hidden_dims)
    ks = jax.random.split(key, 2 * (len(dims) - 1))
    params = []
    for i in range(len(dims) - 1):
        fan_in = dims[i]
        bound = 1.0 / (fan_in ** 0.5)
        w = jax.random.uniform(ks[2 * i], (dims[i], dims[i + 1]),
                               jnp.float32, -bound, bound)
        b = jax.random.uniform(ks[2 * i + 1], (1, dims[i + 1]),
                               jnp.float32, -bound, bound)
        params += [w, b]
    return tuple(params)


def reference_loss(graph_memory, padding_mask, labels, params):
    """Pure-JAX reference of LabelTask.forward's math."""
    w1, b1, w2, b2 = params
    keep = (~jnp.all(padding_mask, axis=0)).astype(jnp.float32)
    nk = jnp.maximum(jnp.sum(keep), 1.0)
    embed = jnp.sum(graph_memory.astype(jnp.float32) * keep[None, :, None],
                    axis=1) / nk
    h = jnp.maximum(embed @ w1 + b1, 0.0)
    prob = jax.nn.sigmoid(h @ w2 + b2)
    y = labels.astype(jnp.float32).reshape(-1, 1)
    bce = -(y * jnp.maximum(jnp.log(prob), -100.0)
            + (1.0 - y) * jnp.maximum(jnp.log(1.0 - prob), -100.0))
    return jnp.mean(bce)


if __name__ == "__main__":
    E = 128
    hidden_dims = [16, 1]

    key = jax.random.PRNGKey(0)
    k_mem, k_lbl, k_mlp, k_mem2, k_lbl2 = jax.random.split(key, 5)
    params = init_mlp_params(k_mlp, E, hidden_dims)  # w1(E,16) b1(1,16) w2(16,1) b2(1,1)

    # --- Case 1: bf16 graph_memory (halves HBM bytes), default tile heuristic
    B, S = 16, 48
    graph_memory = jax.random.normal(k_mem, (B, S, E), jnp.float32).astype(jnp.bfloat16)
    lengths = 4 + (jnp.arange(B, dtype=jnp.int32) % 25)          # max length 28 < S
    padding_mask = jnp.arange(S)[None, :] >= lengths[:, None]    # columns 28.. dropped
    labels = jax.random.bernoulli(k_lbl, 0.5, (B,)).astype(jnp.int32)

    loss1 = label_task_loss(graph_memory, padding_mask, labels, params)
    # Same inputs with an explicit small block_s -> exercises the multi-step
    # S-reduction grid (2 x 3) and bf16's 16-row sublane alignment.
    loss1b = label_task_loss(graph_memory, padding_mask, labels, params,
                             block_b=8, block_s=16)
    ref1 = reference_loss(graph_memory, padding_mask, labels, params)
    jax.block_until_ready((loss1, loss1b))
    assert jnp.allclose(loss1, ref1, atol=2e-5, rtol=2e-5), (loss1, ref1)
    assert jnp.allclose(loss1b, ref1, atol=2e-5, rtol=2e-5), (loss1b, ref1)

    # --- Case 2: f32 graph_memory with ragged B / S (exercises wrapper padding)
    B2, S2 = 10, 20
    graph_memory2 = jax.random.normal(k_mem2, (B2, S2, E), jnp.float32)
    lengths2 = 3 + (jnp.arange(B2, dtype=jnp.int32) % 12)        # max length 14 < S2
    padding_mask2 = jnp.arange(S2)[None, :] >= lengths2[:, None]
    labels2 = jax.random.bernoulli(k_lbl2, 0.5, (B2,)).astype(jnp.int32)

    loss2 = label_task_loss(graph_memory2, padding_mask2, labels2, params)
    ref2 = reference_loss(graph_memory2, padding_mask2, labels2, params)
    jax.block_until_ready(loss2)
    assert jnp.allclose(loss2, ref2, atol=1e-5, rtol=1e-5), (loss2, ref2)

    print("KERNEL_OK")
</pallas_src>

<mosaic_0001>
module attributes {stable_mosaic.version = 11 : i64} {
  func.func @label_task_kernel(%arg0: i32, %arg1: i32, %arg2: memref<8x48x128xbf16, #tpu.memory_space<vmem>>, %arg3: memref<48x1xf32, #tpu.memory_space<vmem>>, %arg4: memref<8x1xf32, #tpu.memory_space<vmem>>, %arg5: memref<128x16xf32, #tpu.memory_space<vmem>>, %arg6: memref<1x16xf32, #tpu.memory_space<vmem>>, %arg7: memref<16x1xf32, #tpu.memory_space<vmem>>, %arg8: memref<1x1xf32, #tpu.memory_space<vmem>>, %arg9: memref<8x1xf32, #tpu.memory_space<vmem>>, %arg10: memref<8x128xf32, #tpu.memory_space<vmem>>) attributes {dimension_semantics = [#tpu.dimension_semantics<parallel>, #tpu.dimension_semantics<arbitrary>], iteration_bounds = array<i64: 2, 1>, scalar_prefetch = 0 : i64, scratch_operands = 1 : i64, tpu.core_type = #tpu.core_type<tc>, window_params = [{transform_indices = @transform_0, window_bounds = array<i64: 8, 48, 128>}, {transform_indices = @transform_1, window_bounds = array<i64: 48, 1>}, {transform_indices = @transform_2, window_bounds = array<i64: 8, 1>}, {pipeline_mode = #tpu.pipeline_mode<synchronous>, transform_indices = @transform_3, window_bounds = array<i64: 128, 16>}, {pipeline_mode = #tpu.pipeline_mode<synchronous>, transform_indices = @transform_4, window_bounds = array<i64: 1, 16>}, {pipeline_mode = #tpu.pipeline_mode<synchronous>, transform_indices = @transform_5, window_bounds = array<i64: 16, 1>}, {pipeline_mode = #tpu.pipeline_mode<synchronous>, transform_indices = @transform_6, window_bounds = array<i64: 1, 1>}, {transform_indices = @transform_7, window_bounds = array<i64: 8, 1>}]} {
    %c0_i32 = arith.constant 0 : i32
    %0 = arith.cmpi eq, %arg1, %c0_i32 : i32
    %1 = arith.extui %0 : i1 to i32
    %c0_i32_0 = arith.constant 0 : i32
    %2 = arith.cmpi ne, %1, %c0_i32_0 : i32
    scf.if %2 {
      %cst_11 = arith.constant 0.000000e+00 : f32
      %16 = vector.broadcast %cst_11 : f32 to vector<8x128xf32>
      %c0_12 = arith.constant 0 : index
      %c0_13 = arith.constant 0 : index
      %17 = vector.load %arg10[%c0_12, %c0_13] : memref<8x128xf32, #tpu.memory_space<vmem>>, vector<8x128xf32>
      tpu.vector_store %arg10[%c0_12, %c0_13], %16 {strides = array<i32>} : memref<8x128xf32, #tpu.memory_space<vmem>>, vector<8x128xf32>,
    } else {
    }
    %c0 = arith.constant 0 : index
    %c0_1 = arith.constant 0 : index
    %c0_2 = arith.constant 0 : index
    %3 = vector.load %arg2[%c0, %c0_1, %c0_2] : memref<8x48x128xbf16, #tpu.memory_space<vmem>>, vector<8x48x128xbf16>
    %4 = arith.extf %3 : vector<8x48x128xbf16> to vector<8x48x128xf32>
    %c0_3 = arith.constant 0 : index
    %c0_4 = arith.constant 0 : index
    %5 = vector.load %arg3[%c0_3, %c0_4] : memref<48x1xf32, #tpu.memory_space<vmem>>, vector<48x1xf32>
    %c0_5 = arith.constant 0 : index
    %c0_6 = arith.constant 0 : index
    %6 = vector.load %arg10[%c0_5, %c0_6] : memref<8x128xf32, #tpu.memory_space<vmem>>, vector<8x128xf32>
    %7 = vector.shape_cast %5 : vector<48x1xf32> to vector<1x48x1xf32>
    %8 = vector.broadcast %7 : vector<1x48x1xf32> to vector<8x48x128xf32>
    %9 = arith.mulf %4, %8 : vector<8x48x128xf32>
    %cst = arith.constant dense<0.000000e+00> : vector<8x128xf32>
    %10 = vector.multi_reduction <add>, %9, %cst [1] : vector<8x48x128xf32> to vector<8x128xf32>
    %11 = arith.addf %6, %10 : vector<8x128xf32>
    %c0_7 = arith.constant 0 : index
    %c0_8 = arith.constant 0 : index
    %12 = vector.load %arg10[%c0_7, %c0_8] : memref<8x128xf32, #tpu.memory_space<vmem>>, vector<8x128xf32>
    tpu.vector_store %arg10[%c0_7, %c0_8], %11 {strides = array<i32>} : memref<8x128xf32, #tpu.memory_space<vmem>>, vector<8x128xf32>,
    %c0_i32_9 = arith.constant 0 : i32
    %13 = arith.cmpi eq, %arg1, %c0_i32_9 : i32
    %14 = arith.extui %13 : i1 to i32
    %c0_i32_10 = arith.constant 0 : i32
    %15 = arith.cmpi ne, %14, %c0_i32_10 : i32
    scf.if %15 {
      %c0_11 = arith.constant 0 : index
      %c0_12 = arith.constant 0 : index
      %16 = vector.load %arg10[%c0_11, %c0_12] : memref<8x128xf32, #tpu.memory_space<vmem>>, vector<8x128xf32>
      %c0_13 = arith.constant 0 : index
      %c0_14 = arith.constant 0 : index
      %17 = vector.load %arg5[%c0_13, %c0_14] : memref<128x16xf32, #tpu.memory_space<vmem>>, vector<128x16xf32>
      %cst_15 = arith.constant dense<0.000000e+00> : vector<8x16xf32>
      %18 = tpu.matmul %16, %17, %cst_15 {dimension_numbers = #tpu.dot_dimension_numbers<[1], [0], [0], [1], [0, 0, 1, 1], [], []>} : vector<8x128xf32>, vector<128x16xf32>, vector<8x16xf32> -> vector<8x16xf32>
      %c0_16 = arith.constant 0 : index
      %c0_17 = arith.constant 0 : index
      %19 = vector.load %arg6[%c0_16, %c0_17] : memref<1x16xf32, #tpu.memory_space<vmem>>, vector<1x16xf32>
      %20 = vector.broadcast %19 : vector<1x16xf32> to vector<8x16xf32>
      %21 = arith.addf %18, %20 : vector<8x16xf32>
      %cst_18 = arith.constant 0.000000e+00 : f32
      %22 = vector.broadcast %cst_18 : f32 to vector<8x16xf32>
      %23 = arith.maximumf %21, %22 : vector<8x16xf32>
      %c0_19 = arith.constant 0 : index
      %c0_20 = arith.constant 0 : index
      %24 = vector.load %arg7[%c0_19, %c0_20] : memref<16x1xf32, #tpu.memory_space<vmem>>, vector<16x1xf32>
      %cst_21 = arith.constant dense<0.000000e+00> : vector<8x1xf32>
      %25 = tpu.matmul %23, %24, %cst_21 {dimension_numbers = #tpu.dot_dimension_numbers<[1], [0], [0], [1], [0, 0, 1, 1], [], []>} : vector<8x16xf32>, vector<16x1xf32>, vector<8x1xf32> -> vector<8x1xf32>
      %c0_22 = arith.constant 0 : index
      %c0_23 = arith.constant 0 : index
      %26 = vector.load %arg8[%c0_22, %c0_23] : memref<1x1xf32, #tpu.memory_space<vmem>>, vector<1x1xf32>
      %27 = vector.broadcast %26 : vector<1x1xf32> to vector<8x1xf32>
      %28 = arith.addf %25, %27 : vector<8x1xf32>
      %29 = arith.negf %28 : vector<8x1xf32>
      %30 = math.exp %29 : vector<8x1xf32>
      %cst_24 = arith.constant 1.000000e+00 : f32
      %31 = vector.broadcast %cst_24 : f32 to vector<8x1xf32>
      %32 = arith.addf %31, %30 : vector<8x1xf32>
      %33 = arith.divf %31, %32 : vector<8x1xf32>
      %c0_25 = arith.constant 0 : index
      %c0_26 = arith.constant 0 : index
      %34 = vector.load %arg4[%c0_25, %c0_26] : memref<8x1xf32, #tpu.memory_space<vmem>>, vector<8x1xf32>
      %35 = math.log %33 : vector<8x1xf32>
      %cst_27 = arith.constant -1.000000e+02 : f32
      %36 = vector.broadcast %cst_27 : f32 to vector<8x1xf32>
      %37 = arith.maximumf %35, %36 : vector<8x1xf32>
      %cst_28 = arith.constant 1.000000e+00 : f32
      %38 = vector.broadcast %cst_28 : f32 to vector<8x1xf32>
      %39 = arith.subf %38, %33 : vector<8x1xf32>
      %40 = math.log %39 : vector<8x1xf32>
      %cst_29 = arith.constant -1.000000e+02 : f32
      %41 = vector.broadcast %cst_29 : f32 to vector<8x1xf32>
      %42 = arith.maximumf %40, %41 : vector<8x1xf32>
      %43 = arith.mulf %34, %37 : vector<8x1xf32>
      %cst_30 = arith.constant 1.000000e+00 : f32
      %44 = vector.broadcast %cst_30 : f32 to vector<8x1xf32>
      %45 = arith.subf %44, %34 : vector<8x1xf32>
      %46 = arith.mulf %45, %42 : vector<8x1xf32>
      %47 = arith.addf %43, %46 : vector<8x1xf32>
      %cst_31 = arith.constant 0.000000e+00 : f32
      %48 = vector.broadcast %cst_31 : f32 to vector<8x1xf32>
      %49 = arith.subf %48, %47 : vector<8x1xf32>
      %c0_32 = arith.constant 0 : index
      %c0_33 = arith.constant 0 : index
      %50 = vector.load %arg9[%c0_32, %c0_33] : memref<8x1xf32, #tpu.memory_space<vmem>>, vector<8x1xf32>
      tpu.vector_store %arg9[%c0_32, %c0_33], %49 {strides = array<i32>} : memref<8x1xf32, #tpu.memory_space<vmem>>, vector<8x1xf32>,
    } else {
    }
    return
  }
  func.func @transform_0(%arg0: i32, %arg1: i32) -> (i32, i32, i32) {
    %c0_i32 = arith.constant 0 : i32
    %c0_i32_0 = arith.constant 0 : i32
    return %arg0, %arg1, %c0_i32 : i32, i32, i32
  }
  func.func @transform_1(%arg0: i32, %arg1: i32) -> (i32, i32) {
    %c0_i32 = arith.constant 0 : i32
    %c0_i32_0 = arith.constant 0 : i32
    return %arg1, %c0_i32 : i32, i32
  }
  func.func @transform_2(%arg0: i32, %arg1: i32) -> (i32, i32) {
    %c0_i32 = arith.constant 0 : i32
    %c0_i32_0 = arith.constant 0 : i32
    return %arg0, %c0_i32 : i32, i32
  }
  func.func @transform_3(%arg0: i32, %arg1: i32) -> (i32, i32) {
    %c0_i32 = arith.constant 0 : i32
    %c0_i32_0 = arith.constant 0 : i32
    %c0_i32_1 = arith.constant 0 : i32
    return %c0_i32, %c0_i32_0 : i32, i32
  }
  func.func @transform_4(%arg0: i32, %arg1: i32) -> (i32, i32) {
    %c0_i32 = arith.constant 0 : i32
    %c0_i32_0 = arith.constant 0 : i32
    %c0_i32_1 = arith.constant 0 : i32
    return %c0_i32, %c0_i32_0 : i32, i32
  }
  func.func @transform_5(%arg0: i32, %arg1: i32) -> (i32, i32) {
    %c0_i32 = arith.constant 0 : i32
    %c0_i32_0 = arith.constant 0 : i32
    %c0_i32_1 = arith.constant 0 : i32
    return %c0_i32, %c0_i32_0 : i32, i32
  }
  func.func @transform_6(%arg0: i32, %arg1: i32) -> (i32, i32) {
    %c0_i32 = arith.constant 0 : i32
    %c0_i32_0 = arith.constant 0 : i32
    %c0_i32_1 = arith.constant 0 : i32
    return %c0_i32, %c0_i32_0 : i32, i32
  }
  func.func @transform_7(%arg0: i32, %arg1: i32) -> (i32, i32) {
    %c0_i32 = arith.constant 0 : i32
    %c0_i32_0 = arith.constant 0 : i32
    return %arg0, %c0_i32 : i32, i32
  }
}

</mosaic_0001>

<bundles_post_ra>
// kernel: tpu_custom_call.1
= control target key start
LH: loop header
LB: loop body
LE: loop exit
PB: predicated region body
PF: predicated region fallthrough
CT: control target
= control target key end

     0   :  { %s1697_s0 = inlined_call_operand.hbm [shape: bf16[16,48,128], index: 0, kind: input, shape index: {}]   ;;  %s1698_s1 = inlined_call_operand.vmem [shape: f32[48,1], index: 1, kind: input, shape index: {}]   ;;  %s1699_s2 = inlined_call_operand.vmem [shape: f32[16,1], index: 2, kind: input, shape index: {}]   ;;  %s1700_s3 = inlined_call_operand.vmem [shape: f32[128,16], index: 3, kind: input, shape index: {}]   ;;  %s1701_s4 = inlined_call_operand.vmem [shape: f32[1,16], index: 4, kind: input, shape index: {}]   ;;  %s1702_s5 = inlined_call_operand.vmem [shape: f32[16,1], index: 5, kind: input, shape index: {}]   ;;  %s1703_s6 = inlined_call_operand.<no memory space> [shape: f32[1,1], index: 6, kind: input, shape index: {}]   ;;  %s1704_s7 = inlined_call_operand.vmem [shape: f32[16,1], index: 7, kind: output, shape index: {}]  }
   0x1   :  { %v12_v0 = vstv %s1703_s6 }
   0x2   :  { %13 = vst [vmem:[#allocation3] sm:$0x1] %v12_v0 }
   0x3   :  { %14 = vsyncpa [#allocation5], 0 }
   0x4   :  { %16 = vsyncpa [#allocation5 + $0x1], 0  ;;  %s1361_s26 = smov 0   ;;  %s1363_s27 = smov 0  }
   0x5   :  { %s1365_s28 = smov 0   ;;  %s1367_s29 = smov 0  }
   0x6   :  { %s1369_s30 = smov 0   ;;  %s1371_s8 = smov 0  }
   0x7 LB: > { %s961_s6 = sadd.s32 4294967295, %s1310_s8   ;;  %s34_s9 = sadd.s32 1, %s1306_s30  ;;  %s1310_s8 = sphi %s1371_s8, %s22_s8   ;;  %s1306_s30 = sphi %s1369_s30, %s1732_s30   ;;  %s1302_s29 = sphi %s1367_s29, %s1731_s29   ;;  %s1298_s28 = sphi %s1365_s28, %s1730_s28   ;;  %s1294_s27 = sphi %s1363_s27, %s1729_s27   ;;  %s1290_s26 = sphi %s1361_s26, %s1728_s26  }
   0x8   : > { %p36_p0 = scmp.ge.s32.totalorder %s34_s9, 2  ;;  %s43_s10 = sadd.s32 1, %s1298_s28 }
   0x9   : > { %p50_p1 = scmp.ne.s32.totalorder %s1298_s28, %s1294_s27  ;;  %p51_p2 = scmp.eq.s32.totalorder %s1310_s8, 0 }
   0xa   : > { %s1734_s9 = smov (%p36_p0, %s34_s9), 0  ;;  %p56_p4 = scmp.ne.s32.totalorder %s1294_s27, %s1290_s26 }
   0xb   : > { %p52_p3 = por %p51_p2, %p50_p1  ;;  %s38_s11 = ssub.s32 %s1306_s30, %s1734_s9 }
   0xc   : > { %p57_p5 = scmp.eq.s32.totalorder %s961_s6, 0  ;;  %p41_p6 = scmp.eq.s32.totalorder %s38_s11, 0 }
   0xd   : > { %p1168_p8 = scmp.lt.s32.totalorder %s1310_s8, 2  ;;  %s263_s14 = sand.u32 1, %s1298_s28  }
   0xe   : > { %p1400_p7 = por %p57_p5, %p56_p4  ;;  %s1160_s15 = smul.u32 3072, %s1306_s30 }
   0xf   : > { %s1406_s13 = scalar_select %p41_p6, %s1298_s28, %s43_s10  }
  0x10   : > { %s1159_s16 = smul.u32 192, %s263_s14  ;;  %s276_s19 = scalar_lea.hbm %s1697_s0, %s1160_s15 }
  0x11   : > { %p1413_p9 = pnand %p1168_p8, %p52_p3  ;;  %s264_s23 = scalar_lea.sflag [#allocation5], %s263_s14 }
  0x12   : > { %s267_s21 = scalar_lea.vmem [#allocation4], %s1159_s16  ;;  %s1312_s25 = smov [#allocation4]  }
  0x13   : > { %s277_s22 = sshll.u32 %s267_s21, 4  ;;  %p1234_p10 = pneg %p1413_p9  ;;  %s278_s22 = int_to_ptr.vmem [resolvable:$true] %s277_s22 }
  0x14   : > { %s1245_s24 = scalar_lea.vmem %s278_s22, 3072  ;;  %s1250_s26 = sshll.u32 %s1312_s25, 4  ;;  %s1251_s26 = int_to_ptr.vmem [resolvable:$false] %s1250_s26 }
  0x15   : > { %p1246_p11 = scmp.ne.s32.totalorder %s278_s22, %s1245_s24  ;;  %s1252_s6 = scalar_lea.vmem %s1251_s26, 6144 }
  0x16   : > { %p1253_p0 = scmp.lt.s32.totalorder %s278_s22, %s1251_s26  ;;  %p1254_p1 = scmp.lt.s32.totalorder %s1252_s6, %s1245_s24 }
  0x17   : > { %p1248_p12 = pnand %p1246_p11, %p1234_p10 }
  0x18   : > { %p1255_p2 = por %p1254_p1, %p1253_p0 }
  0x19   : > { %p1249_p13 = pneg %p1248_p12 }
  0x1b   : > { %p1256_p3 = pnand %p1255_p2, %p1249_p13 }
  0x1d   : > { %1259 = shalt.err (!%p1256_p3)
}
  0x1e   : > { %s1313_s10 = smov 64   ;;  %s1314_s11 = smov 4  }
  0x1f   : > { %1167 = dma.hbm_to_vmem [thread:$0]  (!%p1413_p9), %s276_s19, 3072, %s278_s22, %s264_s23, %s1313_s10, %s1313_s10, %s1314_s11  }
  0x20   : > { %p969_p4 = scmp.ge.s32.totalorder %s1310_s8, 1  ;;  %p292_p5 = scmp.lt.s32.totalorder %s1310_s8, 3 }
  0x22   : > { %p293_p6 = pnand %p969_p4, %p292_p5 }
  0x24   : > { %296 = sbr.rel (%p293_p6) target bundleno = 665 (0x299), region = 48 }
  0x29   : > { %s298_s14 = sand.u32 1, %s1294_s27  }
  0x2a   : > { %s1161_s15 = smul.u32 192, %s298_s14  ;;  %s299_s16 = scalar_lea.sflag [#allocation5], %s298_s14 }
  0x2c   : > { %s1424_s17 = scalar_lea.vmem [#allocation4], %s1161_s15 }
  0x2d   : > { %1285 = dma.done.wait (%p1400_p7), %s299_s16, 3072  }
  0x2e   : > { %1287 = vsyncadd (%p1400_p7), %s299_s16, 4294964224  ;;  %v1315_v1 = vmov 0   ;;  %v460_v2 = vld [vmem:[%s1698_s1 + $0x10] sm:$0xff]  ;;  %v458_v3 = vld [vmem:[%s1698_s1] sm:$0xff]  ;;  %v1705_v6 = vmov 0.0   ;;  %vm1317_vm0 = vmmov 0  }
  0x2f   : > { %1223 = vset.pattern.permute.xlu1 %v1315_v1  ;;  %1222 = vset.pattern.permute.xlu0 %v1315_v1  ;;  %v461_v4 = vld [vmem:[%s1698_s1 + $0x18] sm:$0xff]  ;;  %v459_v5 = vld [vmem:[%s1698_s1 + $0x8] sm:$0xff]  ;;  %v462_v8 = vld [vmem:[%s1698_s1 + $0x20] sm:$0xff]  ;;  %vm639_vm1 = vcmask 1041409   ;;  %vm641_vm2 = vcmask 1042434   ;;  %vm643_vm3 = vcmask 1043459  }
  0x30   : > { %477 = vperm.xlu1 %1223, %v460_v2   ;;  %467 = vperm.xlu0 %1222, %v458_v3   ;;  %v463_v7 = vld [vmem:[%s1698_s1 + $0x28] sm:$0xff]  ;;  %v675_v9 = vld [vmem:[%s1700_s3 + $0x78] sm:$0xff]  ;;  %v674_v10 = vld [vmem:[%s1700_s3 + $0x70] sm:$0xff]  ;;  %vm645_vm4 = vcmask 1044484   ;;  %vm647_vm5 = vcmask 1045509   ;;  %vm649_vm6 = vcmask 1046534  }
  0x31   : > { %1117 = vmatprep.subr.mxu0 %v1705_v6  ;;  %1152 = vmatprep.subr.mxu1 %v1705_v6  ;;  %v673_v11 = vld [vmem:[%s1700_s3 + $0x68] sm:$0xff]  ;;  %v672_v12 = vld [vmem:[%s1700_s3 + $0x60] sm:$0xff]  ;;  %v671_v13 = vld [vmem:[%s1700_s3 + $0x58] sm:$0xff]  ;;  %vm651_vm7 = vcmask 1047559   ;;  %vm763_vm8 = vcmask 130048   ;;  %p349_p7 = scmp.lt.s32.totalorder %s1302_s29, 1 }
  0x32   : > { %1118 = vmatpush3.msra.mxu0 %v675_v9  ;;  %v670_v14 = vld [vmem:[%s1700_s3 + $0x50] sm:$0xff]  ;;  %v669_v15 = vld [vmem:[%s1700_s3 + $0x48] sm:$0xff]  ;;  %v668_v16 = vld [vmem:[%s1700_s3 + $0x40] sm:$0xff]  ;;  %1149 = vmatprep.mubr.msk.f32.mxu0 %vm1317_vm0, %v1705_v6  ;;  %vm856_vm9 = vcmask 7168  }
  0x33   : > { %1119 = vmatprep.subr.mxu0 %v1705_v6  ;;  %v667_v17 = vld [vmem:[%s1700_s3 + $0x38] sm:$0xff]  ;;  %v666_v18 = vld [vmem:[%s1700_s3 + $0x30] sm:$0xff]  ;;  %1156 = vmatprep.mubr.msk.f32.mxu1 %vm1317_vm0, %v1705_v6  ;;  %v665_v19 = vld [vmem:[%s1700_s3 + $0x28] sm:$0xff]  ;;  %s1736_s29 = smov (!%p349_p7, %s1302_s29), 1 }
  0x34   : > { %482 = vperm.xlu1 %1223, %v461_v4   ;;  %472 = vperm.xlu0 %1222, %v459_v5   ;;  %v664_v20 = vld [vmem:[%s1700_s3 + $0x20] sm:$0xff]  ;;  %v663_v21 = vld [vmem:[%s1700_s3 + $0x18] sm:$0xff]  ;;  %v662_v22 = vld [vmem:[%s1700_s3 + $0x10] sm:$0xff]  ;;  %s970_s19 = sshll.u32 %s1736_s29, 3 }
  0x35   : > { %1120 = vmatpush3.msra.mxu0 %v674_v10  ;;  %v661_v23 = vld [vmem:[%s1700_s3 + $0x8] sm:$0xff]  ;;  %v660_v24 = vld [vmem:[%s1700_s3] sm:$0xff]  ;;  %v1525_v28 = vld [vmem:[%s1424_s17 + $0x50] sm:$0xff]   ;;  %s352_s22 = scalar_lea.vmem %s1699_s2, %s970_s19  ;;  %s356_s12 = scalar_lea.vmem %s1704_s7, %s970_s19 }
  0x36   : > { %1121 = vmatprep.subr.mxu0 %v1705_v6  ;;  %v1516_v25 = vld [vmem:[%s1424_s17 + $0x8] sm:$0xff]   ;;  %v1519_v26 = vld [vmem:[%s1424_s17 + $0x20] sm:$0xff]   ;;  %v1522_v27 = vld [vmem:[%s1424_s17 + $0x38] sm:$0xff]   ;;  %1711 = vst [vmem:[#allocation7_spill] sm:$0xff] %v1525_v28  ;;  %v1020_v41 = vunpack.c.l.bf16 %v1525_v28 }
  0x37   : > { %1122 = vmatpush3.msra.mxu0 %v673_v11  ;;  %v1528_v29 = vld [vmem:[%s1424_s17 + $0x68] sm:$0xff]   ;;  %v1531_v30 = vld [vmem:[%s1424_s17 + $0x80] sm:$0xff]   ;;  %v1534_v31 = vld [vmem:[%s1424_s17 + $0x98] sm:$0xff]   ;;  %v984_v34 = vunpack.c.l.bf16 %v1516_v25  ;;  %v996_v35 = vunpack.c.l.bf16 %v1519_v26  ;;  %v1008_v36 = vunpack.c.l.bf16 %v1522_v27  ;;  %v1716_v28 = vunpack.c.h.bf16 %v1516_v25 }
  0x38   : > { %492 = vperm.xlu1 %1223, %v463_v7   ;;  %487 = vperm.xlu0 %1222, %v462_v8   ;;  %v1537_v32 = vld [vmem:[%s1424_s17 + $0xb0] sm:$0xff]   ;;  %v1540_v33 = vld [vmem:[%s1424_s17] sm:$0xff]   ;;  %v1546_v37 = vld [vmem:[%s1424_s17 + $0x18] sm:$0xff]   ;;  %v1032_v42 = vunpack.c.l.bf16 %v1528_v29  ;;  %v1044_v43 = vunpack.c.l.bf16 %v1531_v30  ;;  %v1056_v48 = vunpack.c.l.bf16 %v1534_v31  ;;  %v1033_v60 = vunpack.c.h.bf16 %v1528_v29 }
  0x39   : > { %1123 = vmatprep.subr.mxu0 %v1705_v6  ;;  %1712 = vst [vmem:[#allocation8_spill] sm:$0xff] %v1537_v32  ;;  %v1549_v38 = vld [vmem:[%s1424_s17 + $0x30] sm:$0xff]   ;;  %v1552_v39 = vld [vmem:[%s1424_s17 + $0x48] sm:$0xff]   ;;  %v1559_v44 = vld [vmem:[%s1424_s17 + $0x60] sm:$0xff]   ;;  %v1068_v49 = vunpack.c.l.bf16 %v1537_v32  ;;  %v980_v50 = vunpack.c.l.bf16 %v1540_v33  ;;  %v992_v53 = vunpack.c.l.bf16 %v1546_v37  ;;  %v1045_v0 = vunpack.c.h.bf16 %v1531_v30 }
  0x3a   : > { %1124 = vmatpush3.msra.mxu0 %v672_v12  ;;  %v1562_v45 = vld [vmem:[%s1424_s17 + $0x78] sm:$0xff]   ;;  %v1565_v46 = vld [vmem:[%s1424_s17 + $0x90] sm:$0xff]   ;;  %v1572_v51 = vld [vmem:[%s1424_s17 + $0xa8] sm:$0xff]   ;;  %v1004_v54 = vunpack.c.l.bf16 %v1549_v38  ;;  %v1016_v55 = vunpack.c.l.bf16 %v1552_v39  ;;  %v1028_v57 = vunpack.c.l.bf16 %v1559_v44  ;;  %v1057_v1 = vunpack.c.h.bf16 %v1534_v31 }
  0x3b   : > { %1125 = vmatprep.subr.mxu0 %v1705_v6  ;;  %v1040_v58 = vunpack.c.l.bf16 %v1562_v45  ;;  %v1052_v59 = vunpack.c.l.bf16 %v1565_v46  ;;  %v1584_v61 = vld [vmem:[%s1424_s17 + $0x10] sm:$0xff]   ;;  %v1587_v62 = vld [vmem:[%s1424_s17 + $0x28] sm:$0xff]   ;;  %v1064_v63 = vunpack.c.l.bf16 %v1572_v51  ;;  %v981_v2 = vunpack.c.h.bf16 %v1540_v33  ;;  %v1594_v3 = vld [vmem:[%s1424_s17 + $0x40] sm:$0xff]  }
  0x3c   : > { %1126 = vmatpush3.msra.mxu0 %v671_v13  ;;  %v1597_v4 = vld [vmem:[%s1424_s17 + $0x58] sm:$0xff]   ;;  %v1600_v5 = vld [vmem:[%s1424_s17 + $0x70] sm:$0xff]   ;;  %v993_v7 = vunpack.c.h.bf16 %v1546_v37  ;;  %v1005_v8 = vunpack.c.h.bf16 %v1549_v38  ;;  %v1017_v9 = vunpack.c.h.bf16 %v1552_v39  ;;  %v1029_v10 = vunpack.c.h.bf16 %v1559_v44  ;;  %v1607_v11 = vld [vmem:[%s1424_s17 + $0x88] sm:$0xff]  }
  0x3d   : > { %1127 = vmatprep.subr.mxu0 %v1705_v6  ;;  %v1610_v12 = vld [vmem:[%s1424_s17 + $0xa0] sm:$0xff]   ;;  %v1041_v13 = vunpack.c.h.bf16 %v1562_v45  ;;  %v1000_v29 = vunpack.c.l.bf16 %v1587_v62  ;;  %v1012_v30 = vunpack.c.l.bf16 %v1594_v3  ;;  %v1024_v31 = vunpack.c.l.bf16 %v1597_v4 }
  0x3e   : > { %1128 = vmatpush3.msra.mxu0 %v670_v14  ;;  %v1053_v14 = vunpack.c.h.bf16 %v1565_v46  ;;  %v1036_v33 = vunpack.c.l.bf16 %v1600_v5  ;;  %v1048_v37 = vunpack.c.l.bf16 %v1607_v11  ;;  %v1060_v44 = vunpack.c.l.bf16 %v1610_v12 }
  0x3f   : > { %1129 = vmatprep.subr.mxu0 %v1705_v6 }
  0x40   : > { %1130 = vmatpush3.msra.mxu0 %v669_v15  ;;  %v1065_v15 = vunpack.c.h.bf16 %v1572_v51 }
  0x41   : > { %1131 = vmatprep.subr.mxu0 %v1705_v6 }
  0x42   : > { %1132 = vmatpush3.msra.mxu0 %v668_v16  ;;  %v989_v16 = vunpack.c.h.bf16 %v1584_v61 }
  0x43   : > { %1133 = vmatprep.subr.mxu0 %v1705_v6 }
  0x44   : > { %1134 = vmatpush3.msra.mxu0 %v667_v17  ;;  %v1001_v17 = vunpack.c.h.bf16 %v1587_v62 }
  0x45   : > { %1135 = vmatprep.subr.mxu0 %v1705_v6 }
  0x46   : > { %1136 = vmatpush3.msra.mxu0 %v666_v18  ;;  %v1013_v18 = vunpack.c.h.bf16 %v1594_v3 }
  0x47   : > { %1137 = vmatprep.subr.mxu0 %v1705_v6 }
  0x48   : > { %1138 = vmatpush3.msra.mxu0 %v665_v19  ;;  %v1025_v19 = vunpack.c.h.bf16 %v1597_v4 }
  0x49   : > { %1139 = vmatprep.subr.mxu0 %v1705_v6 }
  0x4a   : > { %1140 = vmatpush3.msra.mxu0 %v664_v20  ;;  %v1037_v20 = vunpack.c.h.bf16 %v1600_v5 }
  0x4b   : > { %1141 = vmatprep.subr.mxu0 %v1705_v6 }
  0x4c   : > { %1142 = vmatpush3.msra.mxu0 %v663_v21  ;;  %v1621_v21 = vld [vmem:[%s1424_s17 + $0xb8] sm:$0xff]  }
  0x4d   : > { %1143 = vmatprep.subr.mxu0 %v1705_v6  ;;  %1713 = vst [vmem:[#allocation9_spill] sm:$0xff] %v1621_v21  ;;  %v1072_v45 = vunpack.c.l.bf16 %v1621_v21 }
  0x4e   : > { %1144 = vmatpush3.msra.mxu0 %v662_v22  ;;  %v1049_v22 = vunpack.c.h.bf16 %v1607_v11 }
  0x4f   : > { %1145 = vmatprep.subr.mxu0 %v1705_v6 }
  0x50   : > { %1146 = vmatpush3.msra.mxu0 %v661_v23  ;;  %v1061_v23 = vunpack.c.h.bf16 %v1610_v12 }
  0x51   : > { %1147 = vmatprep.subr.mxu0 %v1705_v6 }
  0x52   : > { %1148 = vmatpush3.msra.mxu0 %v660_v24  ;;  %v988_v24 = vunpack.c.l.bf16 %v1584_v61 }
  0xab   : > { %v478_v38 = vpop.permute.xlu1 %477  ;;  %v468_v39 = vpop.permute.xlu0 %467 }
  0xac   : > { %v497_v61 = vmul.f32 %v984_v34, %v478_v38  ;;  %v503_v62 = vmul.f32 %v996_v35, %v478_v38  ;;  %v509_v3 = vmul.f32 %v1008_v36, %v478_v38  ;;  %v515_v4 = vmul.f32 %v1020_v41, %v478_v38 }
  0xad   : > { %v521_v5 = vmul.f32 %v1032_v42, %v478_v38  ;;  %v527_v11 = vmul.f32 %v1044_v43, %v478_v38  ;;  %v1641_v6 = vmul.f32 %v1056_v48, %v478_v38  ;;  %v1643_v12 = vmul.f32 %v1068_v49, %v478_v38  ;;  %v1719_v49 = vld [vmem:[#allocation7_spill] sm:$0xff] }
  0xae   : > { %v495_v56 = vmul.f32 %v980_v50, %v468_v39  ;;  %v501_v46 = vmul.f32 %v992_v53, %v468_v39  ;;  %v507_v52 = vmul.f32 %v1004_v54, %v468_v39  ;;  %v513_v51 = vmul.f32 %v1016_v55, %v468_v39 }
  0xaf   : > { %1714 = vst [vmem:[#allocation10_spill] sm:$0xff] %v1641_v6  ;;  %1715 = vst [vmem:[#allocation11_spill] sm:$0xff] %v1643_v12  ;;  %v519_v47 = vmul.f32 %v1028_v57, %v468_v39  ;;  %v525_v40 = vmul.f32 %v1040_v58, %v468_v39  ;;  %v531_v34 = vmul.f32 %v1052_v59, %v468_v39  ;;  %v483_v32 = vpop.permute.xlu1 %482  ;;  %v473_v35 = vpop.permute.xlu0 %472  ;;  %v1717_v41 = vunpack.c.h.bf16 %v1519_v26 }
  0xb0   : > { %v537_v21 = vmul.f32 %v1064_v63, %v468_v39  ;;  %v498_v36 = vmul.f32 %v1716_v28, %v483_v32  ;;  %v1718_v43 = vunpack.c.h.bf16 %v1522_v27  ;;  %v1720_v50 = vunpack.c.h.bf16 %v1719_v49 }
  0xb1   : > { %v504_v42 = vmul.f32 %v1717_v41, %v483_v32  ;;  %v522_v54 = vmul.f32 %v1033_v60, %v483_v32  ;;  %v528_v55 = vmul.f32 %v1045_v0, %v483_v32  ;;  %v534_v57 = vmul.f32 %v1057_v1, %v483_v32 }
  0xb2   : > { %v510_v48 = vmul.f32 %v1718_v43, %v483_v32  ;;  %v516_v53 = vmul.f32 %v1720_v50, %v483_v32  ;;  %v496_v58 = vmul.f32 %v981_v2, %v473_v35  ;;  %v502_v59 = vmul.f32 %v993_v7, %v473_v35 }
  0xb3   : > { %v508_v63 = vmul.f32 %v1005_v8, %v473_v35  ;;  %v514_v38 = vmul.f32 %v1017_v9, %v473_v35  ;;  %v520_v39 = vmul.f32 %v1029_v10, %v473_v35  ;;  %v526_v12 = vmul.f32 %v1041_v13, %v473_v35  ;;  %v493_v26 = vpop.permute.xlu1 %492  ;;  %v488_v50 = vpop.permute.xlu0 %487 }
  0xb4   : > { %v532_v25 = vmul.f32 %v1053_v14, %v473_v35  ;;  %v538_v28 = vmul.f32 %v1065_v15, %v473_v35  ;;  %v543_v6 = vadd.f32 %v496_v58, %v495_v56  ;;  %v554_v41 = vadd.f32 %v502_v59, %v501_v46 }
  0xb5   : > { %v565_v27 = vadd.f32 %v508_v63, %v507_v52  ;;  %v576_v43 = vadd.f32 %v514_v38, %v513_v51  ;;  %v587_v49 = vadd.f32 %v520_v39, %v519_v47  ;;  %v598_v60 = vadd.f32 %v526_v12, %v525_v40 }
  0xb6   : > { %v609_v0 = vadd.f32 %v532_v25, %v531_v34  ;;  %v500_v1 = vmul.f32 %v989_v16, %v493_v26  ;;  %v506_v2 = vmul.f32 %v1001_v17, %v493_v26  ;;  %v512_v7 = vmul.f32 %v1013_v18, %v493_v26  ;;  %v1721_v17 = vld [vmem:[#allocation8_spill] sm:$0xff] }
  0xb7   : > { %v518_v8 = vmul.f32 %v1025_v19, %v493_v26  ;;  %v524_v9 = vmul.f32 %v1037_v20, %v493_v26  ;;  %v530_v10 = vmul.f32 %v1049_v22, %v493_v26  ;;  %v536_v13 = vmul.f32 %v1061_v23, %v493_v26 }
  0xb8   : > { %v499_v14 = vmul.f32 %v988_v24, %v488_v50  ;;  %v505_v15 = vmul.f32 %v1000_v29, %v488_v50  ;;  %v511_v35 = vmul.f32 %v1012_v30, %v488_v50  ;;  %v517_v56 = vmul.f32 %v1024_v31, %v488_v50  ;;  %v1723_v24 = vld [vmem:[#allocation9_spill] sm:$0xff] }
  0xb9   : > { %v523_v58 = vmul.f32 %v1036_v33, %v488_v50  ;;  %v529_v46 = vmul.f32 %v1048_v37, %v488_v50  ;;  %v535_v59 = vmul.f32 %v1060_v44, %v488_v50  ;;  %v541_v52 = vmul.f32 %v1072_v45, %v488_v50  ;;  %v1725_v44 = vld [vmem:[#allocation10_spill] sm:$0xff] }
  0xba   : > { %v544_v51 = vadd.f32 %v543_v6, %v497_v61  ;;  %v555_v47 = vadd.f32 %v554_v41, %v503_v62  ;;  %v566_v63 = vadd.f32 %v565_v27, %v509_v3  ;;  %v577_v40 = vadd.f32 %v576_v43, %v515_v4 }
  0xbb   : > { %v588_v12 = vadd.f32 %v587_v49, %v521_v5  ;;  %v599_v16 = vadd.f32 %v598_v60, %v527_v11  ;;  %v1722_v18 = vunpack.c.h.bf16 %v1721_v17  ;;  %v1724_v29 = vunpack.c.h.bf16 %v1723_v24 }
  0xbc   : > { %v545_v20 = vadd.f32 %v544_v51, %v498_v36  ;;  %v556_v22 = vadd.f32 %v555_v47, %v504_v42  ;;  %v567_v23 = vadd.f32 %v566_v63, %v510_v48  ;;  %v578_v31 = vadd.f32 %v577_v40, %v516_v53  ;;  %v1726_v48 = vld [vmem:[#allocation11_spill] sm:$0xff] }
  0xbd   : > { %v540_v19 = vmul.f32 %v1722_v18, %v483_v32  ;;  %v542_v30 = vmul.f32 %v1724_v29, %v493_v26  ;;  %v589_v33 = vadd.f32 %v588_v12, %v522_v54  ;;  %v600_v37 = vadd.f32 %v599_v16, %v528_v55 }
  0xbe   : > { %v610_v45 = vadd.f32 %v609_v0, %v1725_v44  ;;  %v546_v6 = vadd.f32 %v545_v20, %v499_v14  ;;  %v557_v61 = vadd.f32 %v556_v22, %v505_v15  ;;  %v568_v62 = vadd.f32 %v567_v23, %v511_v35 }
  0xbf   : > { %v620_v3 = vadd.f32 %v538_v28, %v537_v21  ;;  %v579_v4 = vadd.f32 %v578_v31, %v517_v56  ;;  %v590_v5 = vadd.f32 %v589_v33, %v523_v58  ;;  %v601_v11 = vadd.f32 %v600_v37, %v529_v46 }
  0xc0   : > { %v611_v34 = vadd.f32 %v610_v45, %v534_v57  ;;  %v547_v32 = vadd.f32 %v546_v6, %v500_v1  ;;  %v558_v36 = vadd.f32 %v557_v61, %v506_v2  ;;  %v569_v42 = vadd.f32 %v568_v62, %v512_v7 }
  0xc1   : > { %v621_v38 = vadd.f32 %v620_v3, %v1726_v48  ;;  %v580_v39 = vadd.f32 %v579_v4, %v518_v8  ;;  %v591_v25 = vadd.f32 %v590_v5, %v524_v9  ;;  %v602_v53 = vadd.f32 %v601_v11, %v530_v10 }
  0xc2   : > { %v612_v54 = vadd.f32 %v611_v34, %v535_v59  ;;  %v548_v55 = vrot.slane %v547_v32, 4  ;;  %v559_v26 = vrot.slane %v558_v36, 4  ;;  %v570_v41 = vrot.slane %v569_v42, 4 }
  0xc3   : > { %v622_v27 = vadd.f32 %v621_v38, %v540_v19  ;;  %v581_v43 = vrot.slane %v580_v39, 4  ;;  %v592_v49 = vrot.slane %v591_v25, 4  ;;  %v603_v21 = vrot.slane %v602_v53, 4  ;;  %v755_v38 = vld [vmem:[%s1702_s5 + $0x8] sm:$0xff] }
  0xc4   : > { %v613_v28 = vadd.f32 %v612_v54, %v536_v13  ;;  %v549_v50 = vadd.f32 %v548_v55, %v547_v32  ;;  %v560_v57 = vadd.f32 %v559_v26, %v558_v36  ;;  %v571_v60 = vadd.f32 %v570_v41, %v569_v42  ;;  %1153 = vmatpush3.msra.mxu1 %v755_v38 }
  0xc5   : > { %v623_v0 = vadd.f32 %v622_v27, %v541_v52  ;;  %v582_v1 = vadd.f32 %v581_v43, %v580_v39  ;;  %v593_v2 = vadd.f32 %v592_v49, %v591_v25  ;;  %v604_v7 = vadd.f32 %v603_v21, %v602_v53  ;;  %v754_v39 = vld [vmem:[%s1702_s5] sm:$0xff] }
  0xc6   : > { %v614_v8 = vrot.slane %v613_v28, 4  ;;  %v550_v9 = vrot.slane %v549_v50, 2  ;;  %v561_v10 = vrot.slane %v560_v57, 2  ;;  %v572_v14 = vrot.slane %v571_v60, 2  ;;  %v972_v53 = vld [vmem:[%s1701_s4] ss:$0 sm:$0xff] }
  0xc7   : > { %v624_v15 = vadd.f32 %v623_v0, %v542_v30  ;;  %v583_v35 = vrot.slane %v582_v1, 2  ;;  %v594_v56 = vrot.slane %v593_v2, 2  ;;  %v605_v58 = vrot.slane %v604_v7, 2  ;;  %v973_v27 = vld [vmem:[#allocation3] ss:$0 sm:$0xff] }
  0xc8   : > { %v615_v46 = vadd.f32 %v614_v8, %v613_v28  ;;  %v551_v59 = vadd.f32 %v550_v9, %v549_v50  ;;  %v562_v13 = vadd.f32 %v561_v10, %v560_v57  ;;  %v573_v51 = vadd.f32 %v572_v14, %v571_v60 }
  0xc9   : > { %v625_v47 = vrot.slane %v624_v15, 4  ;;  %v584_v63 = vadd.f32 %v583_v35, %v582_v1  ;;  %v595_v40 = vadd.f32 %v594_v56, %v593_v2  ;;  %v606_v52 = vadd.f32 %v605_v58, %v604_v7  ;;  %v843_v2 = vld [vmem:[%s352_s22] sm:$0xff] }
  0xca   : > { %v616_v12 = vrot.slane %v615_v46, 2  ;;  %v552_v16 = vrot.slane %v551_v59, 1  ;;  %v563_v17 = vrot.slane %v562_v13, 1  ;;  %v574_v18 = vrot.slane %v573_v51, 1 }
  0xcb   : > { %v626_v19 = vadd.f32 %v625_v47, %v624_v15  ;;  %v585_v20 = vrot.slane %v584_v63, 1  ;;  %v596_v22 = vrot.slane %v595_v40, 1  ;;  %v607_v23 = vrot.slane %v606_v52, 1 }
  0xcc   : > { %v617_v24 = vadd.f32 %v616_v12, %v615_v46  ;;  %v553_v29 = vadd.f32 %v552_v16, %v551_v59  ;;  %v564_v30 = vadd.f32 %v563_v17, %v562_v13  ;;  %v575_v31 = vadd.f32 %v574_v18, %v573_v51 }
  0xcd   : > { %v627_v33 = vrot.slane %v626_v19, 2  ;;  %v586_v44 = vadd.f32 %v585_v20, %v584_v63  ;;  %v597_v61 = vadd.f32 %v596_v22, %v595_v40  ;;  %v608_v3 = vadd.f32 %v607_v23, %v606_v52 }
  0xce   : > { %v618_v37 = vrot.slane %v617_v24, 1  ;;  %v640_v6 = vsel %vm639_vm1, %v564_v30, %v553_v29  ;;  %v1727_v25 = vmov 0.0   ;;  %v852_v14 = vsub.f32 1.0, %v843_v2 }
  0xcf   : > { %v628_v45 = vadd.f32 %v627_v33, %v626_v19  ;;  %v642_v62 = vsel %vm641_vm2, %v575_v31, %v640_v6  ;;  %1154 = vmatprep.subr.mxu1 %v1727_v25 }
  0xd0   : > { %v644_v5 = vsel %vm643_vm3, %v586_v44, %v642_v62  ;;  %v619_v11 = vadd.f32 %v618_v37, %v617_v24  ;;  %1155 = vmatpush3.msra.mxu1 %v754_v39 }
  0xd1   : > { %v629_v4 = vrot.slane %v628_v45, 1  ;;  %v646_v34 = vsel %vm645_vm4, %v597_v61, %v644_v5 }
  0xd2   : > { %v648_v36 = vsel %vm647_vm5, %v608_v3, %v646_v34 }
  0xd3   : > { %v630_v32 = vadd.f32 %v629_v4, %v628_v45  ;;  %v650_v42 = vsel %vm649_vm6, %v619_v11, %v648_v36 }
  0xd5   : > { %v652_v48 = vsel %vm651_vm7, %v630_v32, %v650_v42 }
  0xd6   : > { %1150 = vmatmul.mubr.f32.vlgmr.msra.gmra.mxu0 %v652_v48 }
 0x196   : > { %v749_v54 = vpop.f32.mrf.mxu0 }
 0x197   : > { %v750_v55 = vadd.f32 %v972_v53, %v749_v54 }
 0x198   : > { %v1151_v26 = vpop.f32.mrf.mxu0 }
 0x199   : > { %v753_v41 = vmax.f32 %v750_v55, 0.0 }
 0x19b   : > { %1157 = vmatmul.mubr.msk.f32.vlgmr.msra.gmra.mxu1 %vm763_vm8, %v753_v41 }
 0x25b   : > { %v833_v43 = vpop.f32.mrf.mxu1 }
 0x25c   : > { %v834_v49 = vadd.f32 %v973_v27, %v833_v43 }
 0x25d   : > { %v1158_v21 = vpop.f32.mrf.mxu1 }
 0x25e   : > { %v975_v28 = vmul.f32 -1.442695, %v834_v49 }
 0x260   : > { %1224 = vpow2.f32 %v975_v28 }
 0x26d   : > { %v1225_v50 = vpop.eup %1224 }
 0x26e   : > { %v840_v57 = vadd.f32 1.0, %v1225_v50 }
 0x270   : > { %1226 = vrcp.f32 %v840_v57 }
 0x27d   : > { %v1227_v60 = vpop.eup %1226 }
 0x27e   : > { %1228 = vlog2.f32 %v1227_v60  ;;  %v847_v0 = vsub.f32 1.0, %v1227_v60 }
 0x280   : > { %1230 = vlog2.f32 %v847_v0 }
 0x28b   : > { %v1229_v1 = vpop.eup %1228 }
 0x28c   : > { %v845_v7 = vmul.f32 0.6931472, %v1229_v1 }
 0x28d   : > { %v1231_v8 = vpop.eup %1230 }
 0x28e   : > { %v846_v9 = vmax.f32 %v845_v7, -100.0  ;;  %v849_v10 = vmul.f32 0.6931472, %v1231_v8 }
 0x290   : > { %v850_v15 = vmax.f32 %v849_v10, -100.0  ;;  %v851_v35 = vmul.f32 %v846_v9, %v843_v2 }
 0x292   : > { %v853_v56 = vmul.f32 %v852_v14, %v850_v15 }
 0x294   : > { %v854_v58 = vadd.f32 %v853_v56, %v851_v35 }
 0x296   : > { %v855_v46 = vsub.f32 0.0, %v854_v58 }
 0x298   : > { %857 = vst.msk [vmem:[%s356_s12] sm:$0xff] %vm856_vm9, %v855_v46 }
 0x299 PF: > { %s22_s8 = sadd.s32 1, %s1310_s8   ;;  %s1728_s26 = smov %s1294_s27 }
 0x29a   : > { %p19_p8 = scmp.ge.s32.totalorder %s22_s8, 4   ;;  %s1729_s27 = smov %s1298_s28 }
 0x29b   : > { %s1730_s28 = smov %s1406_s13  ;;  %s1731_s29 = smov %s1306_s30 }
 0x29c   : > { %s1732_s30 = smov %s1734_s9  ;;  %21 = sbr.rel (!%p19_p8) target bundleno = 7 (0x7), region = 102 }
 0x2a1   :  { %877 = vsyncpa [#allocation5], 1 }
 0x2a2   :  { %879 = vsyncpa [#allocation5 + $0x1], 1 }

</bundles_post_ra>
